<compile_context>
chip_gen: v5e
topology: v5e:2x2
jax: 0.10.0
libtpu: 0.0.40
codegen_flags: <defaults>
</compile_context>

<pallas_src>
import jax
import jax.numpy as jnp
from jax.experimental import pallas as pl
from jax.experimental.pallas import tpu as pltpu


def _label_embedder_kernel(x_ref, drop_ref, uncond_ref, w_ref, b_ref, o_ref):
    # x_ref     : (TM, K)   conditions rows (native dtype, cast in-kernel)
    # drop_ref  : (TM, 1)   int32, 1 -> replace this row with the uncondition
    # uncond_ref: (1, K) or (TM, K)  learned "null" condition (VMEM resident)
    # w_ref     : (K, TH)   bf16 weight tile (constant across the inner M sweep)
    # b_ref     : (1, TH)   f32 bias tile
    # o_ref     : (TM, TH)  output tile (bf16 by default)
    cdt = w_ref.dtype
    x = x_ref[...].astype(cdt)                        # VPU cast, hidden under MXU
    drop = drop_ref[...] > 0                          # (TM, 1) bool
    xc = jnp.where(drop, uncond_ref[...], x)          # (TM, K) bitwise select
    acc = jnp.dot(xc, w_ref[...], preferred_element_type=jnp.float32)  # (TM, TH)
    o_ref[...] = (acc + b_ref[...]).astype(o_ref.dtype)


def _pick_h_tile(hp, target):
    """Largest multiple of 128 dividing hp (hp is a multiple of 128), <= target."""
    target = min(target, hp)
    for cand in range(target - target % 128, 127, -128):
        if hp % cand == 0:
            return cand
    return min(hp, 128)


def _pick_m_tile(M, T, target):
    """Row-tile size: divides M, multiple of 8 (or == M), multiple of T if T>1."""
    if M <= target:
        return M
    for cand in range(target, 7, -1):
        if M % cand == 0 and cand % 8 == 0 and (T == 1 or cand % T == 0):
            return cand
    # TODO(synk): handle ragged M (no nice divisor) with masked edge blocks.
    return M


def _choose_tiles(M, K, Hp, T, x_bytes, out_bytes, budget=24 * 1024 * 1024):
    """Pick (TM, TH) so the double-buffered per-block VMEM stays under budget."""
    tm = _pick_m_tile(M, T, target=256)
    th = _pick_h_tile(Hp, target=2048)

    def vmem_bytes(tm_, th_):
        r_uncond = 1 if T == 1 else tm_
        per = (tm_ * K * x_bytes        # x block
               + K * th_ * 2            # weight block (bf16)
               + tm_ * 4                # drop flags
               + r_uncond * K * 2       # uncondition
               + th_ * 4                # bias
               + tm_ * th_ * out_bytes)  # output block
        return 2 * per                  # double buffering

    while vmem_bytes(tm, th) > budget and th > 128:
        new_th = _pick_h_tile(Hp, target=th - 128)
        if new_th >= th:
            break
        th = new_th
    while vmem_bytes(tm, th) > budget and tm > 8:
        new_tm = _pick_m_tile(M, T, target=max(8, tm // 2))
        if new_tm >= tm:
            break
        tm = new_tm
    return tm, th


def prepare_params(params, compute_dtype=jnp.bfloat16):
    """One-time prep: cast to kernel compute dtype; pad the hidden dim to a
    multiple of 128 only when needed (lane-dense stores)."""
    w = jnp.asarray(params["weight"])                  # (K, H)
    K, H = w.shape
    Hp = ((H + 127) // 128) * 128
    b = jnp.asarray(params["bias"]).reshape(1, H).astype(jnp.float32)
    w = w.astype(compute_dtype)
    if Hp != H:
        w = jnp.zeros((K, Hp), compute_dtype).at[:, :H].set(w)
        b = jnp.zeros((1, Hp), jnp.float32).at[:, :H].set(b)
    uncond = jnp.asarray(params["uncondition"]).astype(compute_dtype)  # (T, K)
    return {"weight": w, "bias": b, "uncondition": uncond, "hidden_size": H}


def label_embedder_forward(conditions, prepared, *, train, dropout_prob,
                           force_drop_ids=None, rng=None, out_dtype=None):
    """JAX/Pallas equivalent of LabelEmbedder.forward.

    conditions: (B, T, K); prepared: output of prepare_params().
    """
    B, T, K = conditions.shape
    w = prepared["weight"]                    # (K, Hp) compute dtype
    bias = prepared["bias"]                   # (1, Hp) f32
    uncond = prepared["uncondition"]          # (T, K)  compute dtype
    H = prepared["hidden_size"]
    Hp = w.shape[1]
    assert uncond.shape == (T, K)
    compute_dtype = w.dtype
    if out_dtype is None:
        out_dtype = compute_dtype             # bf16 output halves writeback

    # Classifier-free-guidance drop decision: cheap (B,)-sized glue in plain JAX.
    use_dropout = dropout_prob > 0
    if (train and use_dropout) or (force_drop_ids is not None):
        if force_drop_ids is None:
            if rng is None:
                raise ValueError("rng is required when train=True, dropout_prob>0 "
                                 "and force_drop_ids is None")
            drop_b = jax.random.uniform(rng, (B,)) < dropout_prob
        else:
            drop_b = (force_drop_ids == 1)
    else:
        drop_b = jnp.zeros((B,), dtype=bool)

    M = B * T
    x2 = conditions.reshape(M, K)                                # free reshape
    drop_rows = jnp.repeat(drop_b.astype(jnp.int32), T).reshape(M, 1)

    x_bytes = jnp.dtype(conditions.dtype).itemsize
    out_bytes = jnp.dtype(out_dtype).itemsize
    TM, TH = _choose_tiles(M, K, Hp, T, x_bytes, out_bytes)
    n_m = M // TM
    n_h = Hp // TH

    if T == 1:
        uncond_in = uncond                                       # (1, K), broadcasts
    else:
        # TM is a multiple of T, and blocks start at multiples of TM, so row i of
        # a block needs uncondition row i % T -> pre-tile once (tiny array).
        uncond_in = jnp.broadcast_to(uncond[None], (TM // T, T, K)).reshape(TM, K)

    # h OUTER: weight/bias block index constant over the inner M sweep (DMA'd
    # once per h tile), and v7x's 2 TCs split the hidden axis, not the batch.
    grid = (n_h, n_m)

    out2 = pl.pallas_call(
        _label_embedder_kernel,
        out_shape=jax.ShapeDtypeStruct((M, Hp), out_dtype),
        grid=grid,
        in_specs=[
            pl.BlockSpec((TM, K), lambda h, m: (m, 0)),          # x rows
            pl.BlockSpec((TM, 1), lambda h, m: (m, 0)),          # drop flags
            pl.BlockSpec(uncond_in.shape, lambda h, m: (0, 0)),  # uncondition (resident)
            pl.BlockSpec((K, TH), lambda h, m: (0, h)),          # weight tile
            pl.BlockSpec((1, TH), lambda h, m: (0, h)),          # bias tile
        ],
        out_specs=pl.BlockSpec((TM, TH), lambda h, m: (m, h)),
        compiler_params=pltpu.CompilerParams(
            dimension_semantics=("parallel", "parallel"),
            vmem_limit_bytes=32 * 1024 * 1024,
        ),
    )(x2, drop_rows, uncond_in, w, bias)

    out = out2.reshape(B, T, Hp)
    if Hp != H:
        out = out[..., :H]                    # only when H % 128 != 0
    return out


def init_params(key, in_size, hidden_size, conditions_shape=(1, 1, 128)):
    kw, kb, ku = jax.random.split(key, 3)
    # nn.Linear default init: U(-1/sqrt(in), 1/sqrt(in)); weight stored as (K, H).
    bound = 1.0 / jnp.sqrt(in_size)
    weight = jax.random.uniform(kw, (in_size, hidden_size), minval=-bound, maxval=bound)
    bias = jax.random.uniform(kb, (hidden_size,), minval=-bound, maxval=bound)
    uncondition = jax.random.normal(ku, conditions_shape[1:]) * 0.02   # (T, K)
    return {"weight": weight, "bias": bias, "uncondition": uncondition}


if __name__ == "__main__":
    # ---- main check: H multiple of 128 (no pad/slice), bf16 in/out, forced drops
    B, T, K, H = 8, 1, 512, 256
    dropout_prob = 0.1

    key = jax.random.PRNGKey(0)
    k_params, k_cond, k_drop = jax.random.split(key, 3)

    params = init_params(k_params, in_size=K, hidden_size=H, conditions_shape=(1, T, K))
    prepared = prepare_params(params, compute_dtype=jnp.bfloat16)

    conditions = jax.random.normal(k_cond, (B, T, K), dtype=jnp.float32).astype(jnp.bfloat16)
    force_drop_ids = jnp.array([0, 1, 1, 0, 1, 0, 0, 1], dtype=jnp.int32)

    out = label_embedder_forward(
        conditions, prepared, train=True, dropout_prob=dropout_prob,
        force_drop_ids=force_drop_ids)
    out = jax.block_until_ready(out)

    # Plain-JAX reference (f32 math on the same bf16-rounded values).
    drop_b = (force_drop_ids == 1)
    x_f32 = conditions.astype(jnp.float32)
    unc_f32 = prepared["uncondition"].astype(jnp.float32)
    w_f32 = prepared["weight"][:, :H].astype(jnp.float32)
    b_f32 = prepared["bias"][0, :H]
    cond_ref = jnp.where(drop_b[:, None, None], unc_f32[None], x_f32)
    ref = jnp.einsum("btk,kh->bth", cond_ref, w_f32) + b_f32

    assert out.shape == (B, T, H)
    assert out.dtype == jnp.bfloat16
    err = float(jnp.max(jnp.abs(out.astype(jnp.float32) - ref)))
    assert err < 5e-2, err

    # ---- random-dropout (rng) path
    out2 = label_embedder_forward(
        conditions, prepared, train=True, dropout_prob=dropout_prob, rng=k_drop)
    jax.block_until_ready(out2)
    assert out2.shape == (B, T, H)

    # ---- padded-hidden (H % 128 != 0) and T > 1 path, f32 conditions
    B2, T2, K2, H2 = 4, 2, 128, 96
    params2 = init_params(jax.random.PRNGKey(1), in_size=K2, hidden_size=H2,
                          conditions_shape=(1, T2, K2))
    prepared2 = prepare_params(params2, compute_dtype=jnp.bfloat16)
    cond2 = jax.random.normal(jax.random.PRNGKey(2), (B2, T2, K2), dtype=jnp.float32)
    fd2 = jnp.array([1, 0, 1, 0], dtype=jnp.int32)
    out3 = label_embedder_forward(
        cond2, prepared2, train=True, dropout_prob=0.1, force_drop_ids=fd2)
    out3 = jax.block_until_ready(out3)

    drop2 = (fd2 == 1)
    c2 = cond2.astype(jnp.bfloat16).astype(jnp.float32)      # kernel casts in-kernel
    u2 = prepared2["uncondition"].astype(jnp.float32)
    w2 = prepared2["weight"][:, :H2].astype(jnp.float32)
    bi2 = prepared2["bias"][0, :H2]
    ref3 = jnp.einsum("btk,kh->bth",
                      jnp.where(drop2[:, None, None], u2[None], c2), w2) + bi2
    assert out3.shape == (B2, T2, H2)
    err3 = float(jnp.max(jnp.abs(out3.astype(jnp.float32) - ref3)))
    assert err3 < 5e-2, err3

    print("KERNEL_OK")
</pallas_src>

<mosaic_0001>
module attributes {stable_mosaic.version = 11 : i64} {
  func.func @_label_embedder_kernel(%arg0: i32, %arg1: i32, %arg2: memref<8x512xbf16, #tpu.memory_space<vmem>>, %arg3: memref<8x1xi32, #tpu.memory_space<vmem>>, %arg4: memref<1x512xbf16, #tpu.memory_space<vmem>>, %arg5: memref<512x256xbf16, #tpu.memory_space<vmem>>, %arg6: memref<1x256xf32, #tpu.memory_space<vmem>>, %arg7: memref<8x256xbf16, #tpu.memory_space<vmem>>) attributes {dimension_semantics = [#tpu.dimension_semantics<parallel>, #tpu.dimension_semantics<parallel>], iteration_bounds = array<i64: 1, 1>, scalar_prefetch = 0 : i64, scratch_operands = 0 : i64, tpu.core_type = #tpu.core_type<tc>, window_params = [{transform_indices = @transform_0, window_bounds = array<i64: 8, 512>}, {transform_indices = @transform_1, window_bounds = array<i64: 8, 1>}, {pipeline_mode = #tpu.pipeline_mode<synchronous>, transform_indices = @transform_2, window_bounds = array<i64: 1, 512>}, {transform_indices = @transform_3, window_bounds = array<i64: 512, 256>}, {transform_indices = @transform_4, window_bounds = array<i64: 1, 256>}, {transform_indices = @transform_5, window_bounds = array<i64: 8, 256>}]} {
    %c0 = arith.constant 0 : index
    %c0_0 = arith.constant 0 : index
    %0 = vector.load %arg2[%c0, %c0_0] : memref<8x512xbf16, #tpu.memory_space<vmem>>, vector<8x512xbf16>
    %c0_1 = arith.constant 0 : index
    %c0_2 = arith.constant 0 : index
    %1 = vector.load %arg3[%c0_1, %c0_2] : memref<8x1xi32, #tpu.memory_space<vmem>>, vector<8x1xi32>
    %c0_i32 = arith.constant 0 : i32
    %2 = vector.broadcast %c0_i32 : i32 to vector<8x1xi32>
    %3 = arith.cmpi sgt, %1, %2 : vector<8x1xi32>
    %c0_3 = arith.constant 0 : index
    %c0_4 = arith.constant 0 : index
    %4 = vector.load %arg4[%c0_3, %c0_4] : memref<1x512xbf16, #tpu.memory_space<vmem>>, vector<1x512xbf16>
    %5 = vector.shape_cast %3 : vector<8x1xi1> to vector<8x1xi1>
    %6 = vector.broadcast %5 : vector<8x1xi1> to vector<8x512xi1>
    %7 = vector.shape_cast %4 : vector<1x512xbf16> to vector<1x512xbf16>
    %8 = vector.broadcast %7 : vector<1x512xbf16> to vector<8x512xbf16>
    %9 = arith.select %6, %8, %0 : vector<8x512xi1>, vector<8x512xbf16>
    %c0_5 = arith.constant 0 : index
    %c0_6 = arith.constant 0 : index
    %10 = vector.load %arg5[%c0_5, %c0_6] : memref<512x256xbf16, #tpu.memory_space<vmem>>, vector<512x256xbf16>
    %cst = arith.constant dense<0.000000e+00> : vector<8x256xf32>
    %11 = tpu.matmul %9, %10, %cst {dimension_numbers = #tpu.dot_dimension_numbers<[1], [0], [0], [1], [0, 0, 1, 1], [], []>} : vector<8x512xbf16>, vector<512x256xbf16>, vector<8x256xf32> -> vector<8x256xf32>
    %c0_7 = arith.constant 0 : index
    %c0_8 = arith.constant 0 : index
    %12 = vector.load %arg6[%c0_7, %c0_8] : memref<1x256xf32, #tpu.memory_space<vmem>>, vector<1x256xf32>
    %13 = vector.broadcast %12 : vector<1x256xf32> to vector<8x256xf32>
    %14 = arith.addf %11, %13 : vector<8x256xf32>
    %15 = arith.truncf %14 : vector<8x256xf32> to vector<8x256xbf16>
    %c0_9 = arith.constant 0 : index
    %c0_10 = arith.constant 0 : index
    %16 = vector.load %arg7[%c0_9, %c0_10] : memref<8x256xbf16, #tpu.memory_space<vmem>>, vector<8x256xbf16>
    tpu.vector_store %arg7[%c0_9, %c0_10], %15 {strides = array<i32>} : memref<8x256xbf16, #tpu.memory_space<vmem>>, vector<8x256xbf16>,
    return
  }
  func.func @transform_0(%arg0: i32, %arg1: i32) -> (i32, i32) {
    %c0_i32 = arith.constant 0 : i32
    %c0_i32_0 = arith.constant 0 : i32
    return %arg1, %c0_i32 : i32, i32
  }
  func.func @transform_1(%arg0: i32, %arg1: i32) -> (i32, i32) {
    %c0_i32 = arith.constant 0 : i32
    %c0_i32_0 = arith.constant 0 : i32
    return %arg1, %c0_i32 : i32, i32
  }
  func.func @transform_2(%arg0: i32, %arg1: i32) -> (i32, i32) {
    %c0_i32 = arith.constant 0 : i32
    %c0_i32_0 = arith.constant 0 : i32
    %c0_i32_1 = arith.constant 0 : i32
    return %c0_i32, %c0_i32_0 : i32, i32
  }
  func.func @transform_3(%arg0: i32, %arg1: i32) -> (i32, i32) {
    %c0_i32 = arith.constant 0 : i32
    %c0_i32_0 = arith.constant 0 : i32
    return %c0_i32, %arg0 : i32, i32
  }
  func.func @transform_4(%arg0: i32, %arg1: i32) -> (i32, i32) {
    %c0_i32 = arith.constant 0 : i32
    %c0_i32_0 = arith.constant 0 : i32
    return %c0_i32, %arg0 : i32, i32
  }
  func.func @transform_5(%arg0: i32, %arg1: i32) -> (i32, i32) {
    %c0_i32 = arith.constant 0 : i32
    return %arg1, %arg0 : i32, i32
  }
}

</mosaic_0001>

<bundles_post_ra>
// kernel: tpu_custom_call.1
= control target key start
LH: loop header
LB: loop body
LE: loop exit
PB: predicated region body
PF: predicated region fallthrough
CT: control target
= control target key end

     0   :  { %10 = vsyncpa [#allocation3], 0  ;;  %s1090_s0 = inlined_call_operand.hbm [shape: bf16[8,512], index: 0, kind: input, shape index: {}]   ;;  %s1091_s1 = inlined_call_operand.vmem [shape: s32[8,1], index: 1, kind: input, shape index: {}]   ;;  %s1092_s2 = inlined_call_operand.vmem [shape: bf16[1,512], index: 2, kind: input, shape index: {}]   ;;  %s1093_s3 = inlined_call_operand.hbm [shape: bf16[512,256], index: 3, kind: input, shape index: {}]   ;;  %s1094_s4 = inlined_call_operand.vmem [shape: f32[1,256], index: 4, kind: input, shape index: {}]   ;;  %s1095_s5 = inlined_call_operand.hbm [shape: bf16[8,256], index: 5, kind: output, shape index: {}]  }
   0x1   :  { %11 = vsyncpa [#allocation6], 0 }
   0x2   :  { %12 = vsyncpa [#allocation4], 0  ;;  %s18_s20 = sshll.u32 %s1090_s0, 4  ;;  %s1031_s21 = smov [#allocation2]   ;;  %s19_s20 = int_to_ptr.hbm [resolvable:$true] %s18_s20 }
   0x3   :  { %s20_s22 = sshll.u32 %s1031_s21, 4  ;;  %s32_s25 = sshll.u32 %s1093_s3, 4  ;;  %s21_s22 = int_to_ptr.vmem [resolvable:$true] %s20_s22  ;;  %s33_s25 = int_to_ptr.hbm [resolvable:$true] %s32_s25 }
   0x4   :  { %23 = dma.hbm_to_vmem [thread:$0]  %s19_s20, 256, %s21_s22, [#allocation3]  }
   0x5   :  { %s1032_s26 = smov [#allocation5]   ;;  %s1033_s28 = smov 128  }
   0x6   :  { %s34_s27 = sshll.u32 %s1032_s26, 4  ;;  %s1034_s29 = smov 8   ;;  %s35_s27 = int_to_ptr.vmem [resolvable:$true] %s34_s27 }
   0x7   :  { %40 = dma.hbm_to_vmem [thread:$0]  %s33_s25, 8192, %s35_s27, [#allocation6], %s1033_s28, %s1033_s28, %s1034_s29  }
   0x8   :  { %1025 = dma.done.wait [#allocation3], 256  }
   0x9   :  { %1026 = vsyncadd [#allocation3], 4294967040 }
   0xa   :  { %1027 = dma.done.wait [#allocation6], 8192  }
   0xb   :  { %1028 = vsyncadd [#allocation6], 4294959104  ;;  %v1035_v0 = vmov 0   ;;  %v55_v1 = vld [vmem:[%s1091_s1] sm:$0xff]  ;;  %v684_v2 = vld [vmem:[#allocation5 + $0x70] sm:$0xf] }
   0xc   :  { %952 = vset.pattern.permute.xlu0 %v1035_v0  ;;  %v897_v3 = vld [vmem:[#allocation5 + $0x74] sm:$0xf0]  ;;  %vm56_vm0 = vcmp.gt.s32.totalorder %v55_v1, 0  ;;  %v748_v5 = vld [vmem:[#allocation5 + $0xf0] sm:$0xf]  ;;  %s1036_s7 = smov [#allocation7]  }
   0xd   :  { %v685_v4 = vor.u32 %v897_v3, %v684_v2  ;;  %v913_v6 = vld [vmem:[#allocation5 + $0xf4] sm:$0xf0]  ;;  %v58_v7 = vsel %vm56_vm0, 1, %v1035_v0  ;;  %v812_v9 = vld [vmem:[#allocation5 + $0x170] sm:$0xf]  ;;  %s611_s8 = sshll.u32 %s1036_s7, 4  ;;  %s612_s8 = int_to_ptr.vmem [resolvable:$true] %s611_s8 }
   0xe   :  { %v749_v8 = vor.u32 %v913_v6, %v748_v5  ;;  %v929_v10 = vld [vmem:[#allocation5 + $0x174] sm:$0xf0]  ;;  %60 = vperm.xlu0 %952, %v58_v7   ;;  %v876_v12 = vld [vmem:[#allocation5 + $0x1f0] sm:$0xf]  ;;  %v676_v14 = vld [vmem:[#allocation5 + $0x60] sm:$0xf] }
   0xf   :  { %500 = vmatpush.bf16.msra.mxu0 %v685_v4  ;;  %v813_v11 = vor.u32 %v929_v10, %v812_v9  ;;  %v945_v13 = vld [vmem:[#allocation5 + $0x1f4] sm:$0xf0]  ;;  %v895_v16 = vld [vmem:[#allocation5 + $0x64] sm:$0xf0]  ;;  %v740_v17 = vld [vmem:[#allocation5 + $0xe0] sm:$0xf] }
  0x10   :  { %513 = vmatpush.bf16.msra.mxu1 %v749_v8  ;;  %v877_v15 = vor.u32 %v945_v13, %v876_v12  ;;  %v911_v18 = vld [vmem:[#allocation5 + $0xe4] sm:$0xf0]  ;;  %v677_v19 = vor.u32 %v895_v16, %v676_v14  ;;  %v804_v21 = vld [vmem:[#allocation5 + $0x160] sm:$0xf]  ;;  %v668_v26 = vld [vmem:[#allocation5 + $0x50] sm:$0xf] }
  0x11   :  { %526 = vmatpush.bf16.msra.mxu2 %v813_v11  ;;  %v741_v20 = vor.u32 %v911_v18, %v740_v17  ;;  %v927_v22 = vld [vmem:[#allocation5 + $0x164] sm:$0xf0]  ;;  %v868_v23 = vld [vmem:[#allocation5 + $0x1e0] sm:$0xf]  ;;  %v893_v27 = vld [vmem:[#allocation5 + $0x54] sm:$0xf0] }
  0x12   :  { %539 = vmatpush.bf16.msra.mxu3 %v877_v15  ;;  %v805_v24 = vor.u32 %v927_v22, %v804_v21  ;;  %v943_v25 = vld [vmem:[#allocation5 + $0x1e4] sm:$0xf0]  ;;  %v669_v29 = vor.u32 %v893_v27, %v668_v26  ;;  %v732_v30 = vld [vmem:[#allocation5 + $0xd0] sm:$0xf]  ;;  %v909_v31 = vld [vmem:[#allocation5 + $0xd4] sm:$0xf0] }
  0x13   :  { %501 = vmatpush.bf16.msra.mxu0 %v677_v19  ;;  %v869_v28 = vor.u32 %v943_v25, %v868_v23  ;;  %v796_v32 = vld [vmem:[#allocation5 + $0x150] sm:$0xf]  ;;  %v733_v33 = vor.u32 %v909_v31, %v732_v30  ;;  %v925_v34 = vld [vmem:[#allocation5 + $0x154] sm:$0xf0]  ;;  %v660_v38 = vld [vmem:[#allocation5 + $0x40] sm:$0xf] }
  0x14   :  { %514 = vmatpush.bf16.msra.mxu1 %v741_v20  ;;  %v860_v35 = vld [vmem:[#allocation5 + $0x1d0] sm:$0xf]  ;;  %v941_v36 = vld [vmem:[#allocation5 + $0x1d4] sm:$0xf0]  ;;  %v797_v37 = vor.u32 %v925_v34, %v796_v32  ;;  %v891_v39 = vld [vmem:[#allocation5 + $0x44] sm:$0xf0] }
  0x15   :  { %527 = vmatpush.bf16.msra.mxu2 %v805_v24  ;;  %v724_v40 = vld [vmem:[#allocation5 + $0xc0] sm:$0xf]  ;;  %v861_v41 = vor.u32 %v941_v36, %v860_v35  ;;  %v907_v42 = vld [vmem:[#allocation5 + $0xc4] sm:$0xf0]  ;;  %v661_v45 = vor.u32 %v891_v39, %v660_v38  ;;  %v652_v49 = vld [vmem:[#allocation5 + $0x30] sm:$0xf] }
  0x16   :  { %540 = vmatpush.bf16.msra.mxu3 %v869_v28  ;;  %v788_v43 = vld [vmem:[#allocation5 + $0x140] sm:$0xf]  ;;  %v923_v44 = vld [vmem:[#allocation5 + $0x144] sm:$0xf0]  ;;  %v725_v48 = vor.u32 %v907_v42, %v724_v40  ;;  %v889_v50 = vld [vmem:[#allocation5 + $0x34] sm:$0xf0] }
  0x17   :  { %502 = vmatpush.bf16.msra.mxu0 %v669_v29  ;;  %v852_v46 = vld [vmem:[#allocation5 + $0x1c0] sm:$0xf]  ;;  %v939_v47 = vld [vmem:[#allocation5 + $0x1c4] sm:$0xf0]  ;;  %v789_v51 = vor.u32 %v923_v44, %v788_v43  ;;  %v716_v52 = vld [vmem:[#allocation5 + $0xb0] sm:$0xf]  ;;  %v653_v57 = vor.u32 %v889_v50, %v652_v49 }
  0x18   :  { %515 = vmatpush.bf16.msra.mxu1 %v733_v33  ;;  %v905_v53 = vld [vmem:[#allocation5 + $0xb4] sm:$0xf0]  ;;  %v853_v54 = vor.u32 %v939_v47, %v852_v46  ;;  %v780_v55 = vld [vmem:[#allocation5 + $0x130] sm:$0xf]  ;;  %v644_v61 = vld [vmem:[#allocation5 + $0x20] sm:$0xf] }
  0x19   :  { %528 = vmatpush.bf16.msra.mxu2 %v797_v37  ;;  %v921_v56 = vld [vmem:[#allocation5 + $0x134] sm:$0xf0]  ;;  %v844_v58 = vld [vmem:[#allocation5 + $0x1b0] sm:$0xf]  ;;  %v717_v60 = vor.u32 %v905_v53, %v716_v52  ;;  %v887_v62 = vld [vmem:[#allocation5 + $0x24] sm:$0xf0] }
  0x1a   :  { %541 = vmatpush.bf16.msra.mxu3 %v861_v41  ;;  %v937_v59 = vld [vmem:[#allocation5 + $0x1b4] sm:$0xf0]  ;;  %v781_v63 = vor.u32 %v921_v56, %v780_v55  ;;  %v708_v1 = vld [vmem:[#allocation5 + $0xa0] sm:$0xf]  ;;  %v903_v2 = vld [vmem:[#allocation5 + $0xa4] sm:$0xf0]  ;;  %v645_v6 = vor.u32 %v887_v62, %v644_v61 }
  0x1b   :  { %503 = vmatpush.bf16.msra.mxu0 %v661_v45  ;;  %v845_v3 = vor.u32 %v937_v59, %v844_v58  ;;  %v772_v4 = vld [vmem:[#allocation5 + $0x120] sm:$0xf]  ;;  %v919_v5 = vld [vmem:[#allocation5 + $0x124] sm:$0xf0]  ;;  %v709_v9 = vor.u32 %v903_v2, %v708_v1  ;;  %v636_v10 = vld [vmem:[#allocation5 + $0x10] sm:$0xf] }
  0x1c   :  { %516 = vmatpush.bf16.msra.mxu1 %v725_v48  ;;  %v836_v7 = vld [vmem:[#allocation5 + $0x1a0] sm:$0xf]  ;;  %v935_v8 = vld [vmem:[#allocation5 + $0x1a4] sm:$0xf0]  ;;  %v885_v11 = vld [vmem:[#allocation5 + $0x14] sm:$0xf0]  ;;  %v773_v12 = vor.u32 %v919_v5, %v772_v4 }
  0x1d   :  { %529 = vmatpush.bf16.msra.mxu2 %v789_v51  ;;  %v700_v13 = vld [vmem:[#allocation5 + $0x90] sm:$0xf]  ;;  %v901_v14 = vld [vmem:[#allocation5 + $0x94] sm:$0xf0]  ;;  %v837_v15 = vor.u32 %v935_v8, %v836_v7  ;;  %v637_v19 = vor.u32 %v885_v11, %v636_v10  ;;  %v628_v21 = vld [vmem:[#allocation5] sm:$0xf] }
  0x1e   :  { %542 = vmatpush.bf16.msra.mxu3 %v853_v54  ;;  %v764_v16 = vld [vmem:[#allocation5 + $0x110] sm:$0xf]  ;;  %v917_v17 = vld [vmem:[#allocation5 + $0x114] sm:$0xf0]  ;;  %v883_v22 = vld [vmem:[#allocation5 + $0x4] sm:$0xf0]  ;;  %v701_v23 = vor.u32 %v901_v14, %v700_v13 }
  0x1f   :  { %504 = vmatpush.bf16.msra.mxu0 %v653_v57  ;;  %v828_v18 = vld [vmem:[#allocation5 + $0x190] sm:$0xf]  ;;  %v933_v20 = vld [vmem:[#allocation5 + $0x194] sm:$0xf0]  ;;  %v692_v24 = vld [vmem:[#allocation5 + $0x80] sm:$0xf]  ;;  %v765_v27 = vor.u32 %v917_v17, %v764_v16  ;;  %v629_v35 = vor.u32 %v883_v22, %v628_v21 }
  0x20   :  { %517 = vmatpush.bf16.msra.mxu1 %v717_v60  ;;  %v899_v25 = vld [vmem:[#allocation5 + $0x84] sm:$0xf0]  ;;  %v756_v26 = vld [vmem:[#allocation5 + $0x100] sm:$0xf]  ;;  %v896_v29 = vld [vmem:[#allocation5 + $0x74] sm:$0xf]  ;;  %v829_v31 = vor.u32 %v933_v20, %v828_v18 }
  0x21   :  { %530 = vmatpush.bf16.msra.mxu2 %v781_v63  ;;  %v915_v28 = vld [vmem:[#allocation5 + $0x104] sm:$0xf0]  ;;  %v686_v30 = vld [vmem:[#allocation5 + $0x78] sm:$0xf0]  ;;  %v820_v32 = vld [vmem:[#allocation5 + $0x180] sm:$0xf]  ;;  %v693_v39 = vor.u32 %v899_v25, %v692_v24 }
  0x22   :  { %543 = vmatpush.bf16.msra.mxu3 %v845_v3  ;;  %v912_v33 = vld [vmem:[#allocation5 + $0xf4] sm:$0xf]  ;;  %v750_v34 = vld [vmem:[#allocation5 + $0xf8] sm:$0xf0]  ;;  %v931_v36 = vld [vmem:[#allocation5 + $0x184] sm:$0xf0]  ;;  %v689_v40 = vor.u32 %v896_v29, %v686_v30  ;;  %v757_v43 = vor.u32 %v915_v28, %v756_v26 }
  0x23   :  { %505 = vmatpush.bf16.msra.mxu0 %v645_v6  ;;  %v928_v37 = vld [vmem:[#allocation5 + $0x174] sm:$0xf]  ;;  %v814_v38 = vld [vmem:[#allocation5 + $0x178] sm:$0xf0]  ;;  %v753_v44 = vor.u32 %v912_v33, %v750_v34  ;;  %v894_v45 = vld [vmem:[#allocation5 + $0x64] sm:$0xf]  ;;  %v821_v47 = vor.u32 %v931_v36, %v820_v32 }
  0x24   :  { %518 = vmatpush.bf16.msra.mxu1 %v709_v9  ;;  %v944_v41 = vld [vmem:[#allocation5 + $0x1f4] sm:$0xf]  ;;  %v878_v42 = vld [vmem:[#allocation5 + $0x1f8] sm:$0xf0]  ;;  %v678_v46 = vld [vmem:[#allocation5 + $0x68] sm:$0xf0]  ;;  %v817_v48 = vor.u32 %v928_v37, %v814_v38 }
  0x25   :  { %531 = vmatpush.bf16.msra.mxu2 %v773_v12  ;;  %v910_v49 = vld [vmem:[#allocation5 + $0xe4] sm:$0xf]  ;;  %v742_v50 = vld [vmem:[#allocation5 + $0xe8] sm:$0xf0]  ;;  %v881_v51 = vor.u32 %v944_v41, %v878_v42  ;;  %v681_v54 = vor.u32 %v894_v45, %v678_v46  ;;  %v57_v60 = vld [vmem:[%s1092_s2] sm:$0xf] }
  0x26   :  { %544 = vmatpush.bf16.msra.mxu3 %v837_v15  ;;  %v926_v52 = vld [vmem:[#allocation5 + $0x164] sm:$0xf]  ;;  %v806_v53 = vld [vmem:[#allocation5 + $0x168] sm:$0xf0]  ;;  %v745_v57 = vor.u32 %v910_v49, %v742_v50  ;;  %64 = vst [vmem:[#allocation1] ss:$9 sm:$0xff] %v57_v60 }
  0x27   :  { %506 = vmatpush.bf16.msra.mxu0 %v637_v19  ;;  %v942_v55 = vld [vmem:[#allocation5 + $0x1e4] sm:$0xf]  ;;  %v870_v56 = vld [vmem:[#allocation5 + $0x1e8] sm:$0xf0]  ;;  %v809_v58 = vor.u32 %v926_v52, %v806_v53  ;;  %v892_v61 = vld [vmem:[#allocation5 + $0x54] sm:$0xf] }
  0x28   :  { %519 = vmatpush.bf16.msra.mxu1 %v701_v23  ;;  %v873_v59 = vor.u32 %v942_v55, %v870_v56  ;;  %v670_v62 = vld [vmem:[#allocation5 + $0x58] sm:$0xf0]  ;;  %v908_v63 = vld [vmem:[#allocation5 + $0xd4] sm:$0xf]  ;;  %v890_v10 = vld [vmem:[#allocation5 + $0x44] sm:$0xf] }
  0x29   :  { %532 = vmatpush.bf16.msra.mxu2 %v765_v27  ;;  %v673_v1 = vor.u32 %v892_v61, %v670_v62  ;;  %v734_v2 = vld [vmem:[#allocation5 + $0xd8] sm:$0xf0]  ;;  %v924_v3 = vld [vmem:[#allocation5 + $0x154] sm:$0xf]  ;;  %v662_v11 = vld [vmem:[#allocation5 + $0x48] sm:$0xf0] }
  0x2a   :  { %545 = vmatpush.bf16.msra.mxu3 %v829_v31  ;;  %v798_v4 = vld [vmem:[#allocation5 + $0x158] sm:$0xf0]  ;;  %v737_v5 = vor.u32 %v908_v63, %v734_v2  ;;  %v940_v7 = vld [vmem:[#allocation5 + $0x1d4] sm:$0xf]  ;;  %v906_v12 = vld [vmem:[#allocation5 + $0xc4] sm:$0xf]  ;;  %v665_v13 = vor.u32 %v890_v10, %v662_v11 }
  0x2b   :  { %507 = vmatpush.bf16.msra.mxu0 %v629_v35  ;;  %v801_v6 = vor.u32 %v924_v3, %v798_v4  ;;  %v862_v8 = vld [vmem:[#allocation5 + $0x1d8] sm:$0xf0]  ;;  %v726_v14 = vld [vmem:[#allocation5 + $0xc8] sm:$0xf0]  ;;  %v922_v15 = vld [vmem:[#allocation5 + $0x144] sm:$0xf] }
  0x2c   :  { %520 = vmatpush.bf16.msra.mxu1 %v693_v39  ;;  %v865_v9 = vor.u32 %v940_v7, %v862_v8  ;;  %v790_v16 = vld [vmem:[#allocation5 + $0x148] sm:$0xf0]  ;;  %v729_v17 = vor.u32 %v906_v12, %v726_v14  ;;  %v938_v19 = vld [vmem:[#allocation5 + $0x1c4] sm:$0xf]  ;;  %v888_v22 = vld [vmem:[#allocation5 + $0x34] sm:$0xf] }
  0x2d   :  { %533 = vmatpush.bf16.msra.mxu2 %v757_v43  ;;  %v793_v18 = vor.u32 %v922_v15, %v790_v16  ;;  %v854_v20 = vld [vmem:[#allocation5 + $0x1c8] sm:$0xf0]  ;;  %v654_v23 = vld [vmem:[#allocation5 + $0x38] sm:$0xf0]  ;;  %v904_v24 = vld [vmem:[#allocation5 + $0xb4] sm:$0xf] }
  0x2e   :  { %546 = vmatpush.bf16.msra.mxu3 %v821_v47  ;;  %v857_v21 = vor.u32 %v938_v19, %v854_v20  ;;  %v718_v25 = vld [vmem:[#allocation5 + $0xb8] sm:$0xf0]  ;;  %v920_v26 = vld [vmem:[#allocation5 + $0x134] sm:$0xf]  ;;  %v657_v27 = vor.u32 %v888_v22, %v654_v23  ;;  %v886_v33 = vld [vmem:[#allocation5 + $0x24] sm:$0xf]  ;;  %v87_v23 = vunpack.c.l.b16 %v1035_v0 }
  0x2f   :  { %552 = vmatpush.bf16.msrb.mxu0 %v689_v40  ;;  %v721_v28 = vor.u32 %v904_v24, %v718_v25  ;;  %v782_v29 = vld [vmem:[#allocation5 + $0x138] sm:$0xf0]  ;;  %v936_v30 = vld [vmem:[#allocation5 + $0x1b4] sm:$0xf]  ;;  %v646_v34 = vld [vmem:[#allocation5 + $0x28] sm:$0xf0]  ;;  %v88_v24 = vunpack.c.h.b16 %v1035_v0 }
  0x30   :  { %565 = vmatpush.bf16.msrb.mxu1 %v753_v44  ;;  %v785_v31 = vor.u32 %v920_v26, %v782_v29  ;;  %v846_v32 = vld [vmem:[#allocation5 + $0x1b8] sm:$0xf0]  ;;  %v649_v36 = vor.u32 %v886_v33, %v646_v34  ;;  %v902_v37 = vld [vmem:[#allocation5 + $0xa4] sm:$0xf]  ;;  %v710_v38 = vld [vmem:[#allocation5 + $0xa8] sm:$0xf0] }
  0x31   :  { %578 = vmatpush.bf16.msrb.mxu2 %v817_v48  ;;  %v849_v35 = vor.u32 %v936_v30, %v846_v32  ;;  %v918_v39 = vld [vmem:[#allocation5 + $0x124] sm:$0xf]  ;;  %v713_v40 = vor.u32 %v902_v37, %v710_v38  ;;  %v774_v41 = vld [vmem:[#allocation5 + $0x128] sm:$0xf0]  ;;  %v884_v46 = vld [vmem:[#allocation5 + $0x14] sm:$0xf] }
  0x32   :  { %591 = vmatpush.bf16.msrb.mxu3 %v881_v51  ;;  %v934_v42 = vld [vmem:[#allocation5 + $0x1a4] sm:$0xf]  ;;  %v838_v43 = vld [vmem:[#allocation5 + $0x1a8] sm:$0xf0]  ;;  %v777_v44 = vor.u32 %v918_v39, %v774_v41  ;;  %v638_v47 = vld [vmem:[#allocation5 + $0x18] sm:$0xf0] }
  0x33   :  { %553 = vmatpush.bf16.msrb.mxu0 %v681_v54  ;;  %v841_v45 = vor.u32 %v934_v42, %v838_v43  ;;  %v900_v48 = vld [vmem:[#allocation5 + $0x94] sm:$0xf]  ;;  %v702_v49 = vld [vmem:[#allocation5 + $0x98] sm:$0xf0]  ;;  %v641_v52 = vor.u32 %v884_v46, %v638_v47  ;;  %v882_v56 = vld [vmem:[#allocation5 + $0x4] sm:$0xf] }
  0x34   :  { %566 = vmatpush.bf16.msrb.mxu1 %v745_v57  ;;  %v916_v50 = vld [vmem:[#allocation5 + $0x114] sm:$0xf]  ;;  %v766_v51 = vld [vmem:[#allocation5 + $0x118] sm:$0xf0]  ;;  %v705_v53 = vor.u32 %v900_v48, %v702_v49  ;;  %v694_v60 = vld [vmem:[#allocation5 + $0x88] sm:$0xf0] }
  0x35   :  { %579 = vmatpush.bf16.msrb.mxu2 %v809_v58  ;;  %v932_v54 = vld [vmem:[#allocation5 + $0x194] sm:$0xf]  ;;  %v830_v55 = vld [vmem:[#allocation5 + $0x198] sm:$0xf0]  ;;  %v769_v57 = vor.u32 %v916_v50, %v766_v51  ;;  %v630_v58 = vld [vmem:[#allocation5 + $0x8] sm:$0xf0] }
  0x36   :  { %592 = vmatpush.bf16.msrb.mxu3 %v873_v59  ;;  %v898_v59 = vld [vmem:[#allocation5 + $0x84] sm:$0xf]  ;;  %v833_v61 = vor.u32 %v932_v54, %v830_v55  ;;  %v758_v63 = vld [vmem:[#allocation5 + $0x108] sm:$0xf0]  ;;  %v633_v3 = vor.u32 %v882_v56, %v630_v58  ;;  %v53_v7 = vld [vmem:[#allocation2] sm:$0xff]  ;;  %s613_s10 = sshll.u32 %s1095_s5, 4  ;;  %s614_s10 = int_to_ptr.hbm [resolvable:$true] %s613_s10 }
  0x37   :  { %554 = vmatpush.bf16.msrb.mxu0 %v673_v1  ;;  %v914_v62 = vld [vmem:[#allocation5 + $0x104] sm:$0xf]  ;;  %v822_v2 = vld [vmem:[#allocation5 + $0x188] sm:$0xf0]  ;;  %v697_v4 = vor.u32 %v898_v59, %v694_v60  ;;  %v54_v10 = vld [vmem:[#allocation2 + $0x8] sm:$0xff]  ;;  %v94_v14 = vunpack.c.l.b16 %v53_v7  ;;  %v95_v15 = vunpack.c.h.b16 %v53_v7 }
  0x38   :  { %567 = vmatpush.bf16.msrb.mxu1 %v737_v5  ;;  %v930_v1 = vld [vmem:[#allocation5 + $0x184] sm:$0xf]  ;;  %v761_v5 = vor.u32 %v914_v62, %v758_v63  ;;  %v65_v8 = vld [vmem:[#allocation1] sm:$0xff]  ;;  %v67_v11 = vld [vmem:[#allocation1 + $0x12] sm:$0xff] }
  0x39   :  { %580 = vmatpush.bf16.msrb.mxu2 %v801_v6  ;;  %v825_v6 = vor.u32 %v930_v1, %v822_v2  ;;  %v68_v12 = vld [vmem:[#allocation1 + $0x1b] sm:$0xff]  ;;  %v69_v16 = vpack.i.b16 %v65_v8, %v65_v8  ;;  %v75_v19 = vpack.i.b16 %v67_v11, %v67_v11  ;;  %v98_v26 = vpack.c.b16 %v94_v14, %v94_v14 }
  0x3a   :  { %593 = vmatpush.bf16.msrb.mxu3 %v865_v9  ;;  %v66_v9 = vld [vmem:[#allocation1 + $0x9] sm:$0xff]  ;;  %v78_v20 = vpack.i.b16 %v68_v12, %v68_v12  ;;  %v99_v29 = vpack.c.b16 %v95_v15, %v95_v15 }
  0x3b   :  { %555 = vmatpush.bf16.msrb.mxu0 %v665_v13  ;;  %v77_v32 = vperm.slane %v75_v19, 0 }
  0x3c   :  { %568 = vmatpush.bf16.msrb.mxu1 %v729_v17  ;;  %v72_v17 = vpack.i.b16 %v66_v9, %v66_v9  ;;  %v80_v33 = vperm.slane %v78_v20, 0 }
  0x3d   :  { %581 = vmatpush.bf16.msrb.mxu2 %v793_v18  ;;  %v96_v18 = vunpack.c.l.b16 %v54_v10 }
  0x3e   :  { %594 = vmatpush.bf16.msrb.mxu3 %v857_v21  ;;  %v97_v21 = vunpack.c.h.b16 %v54_v10 }
  0x3f   :  { %556 = vmatpush.bf16.msrb.mxu0 %v657_v27  ;;  %v71_v27 = vperm.slane %v69_v16, 0  ;;  %v100_v30 = vpack.c.b16 %v96_v18, %v96_v18 }
  0x40   :  { %569 = vmatpush.bf16.msrb.mxu1 %v721_v28  ;;  %v74_v28 = vperm.slane %v72_v17, 0  ;;  %v101_v34 = vpack.c.b16 %v97_v21, %v97_v21 }
  0x41   :  { %582 = vmatpush.bf16.msrb.mxu2 %v785_v31 }
  0x42   :  { %595 = vmatpush.bf16.msrb.mxu3 %v849_v35 }
  0x43   :  { %557 = vmatpush.bf16.msrb.mxu0 %v649_v36 }
  0x44   :  { %570 = vmatpush.bf16.msrb.mxu1 %v713_v40 }
  0x45   :  { %583 = vmatpush.bf16.msrb.mxu2 %v777_v44  ;;  %v174_v44 = vld [vmem:[%s1094_s4] sm:$0x3] }
  0x46   :  { %596 = vmatpush.bf16.msrb.mxu3 %v841_v45  ;;  %v176_v45 = vperm.slane %v174_v44, 0  ;;  %v177_v46 = vperm.slane %v174_v44, 1 }
  0x47   :  { %558 = vmatpush.bf16.msrb.mxu0 %v641_v52 }
  0x48   :  { %571 = vmatpush.bf16.msrb.mxu1 %v705_v53 }
  0x49   :  { %584 = vmatpush.bf16.msrb.mxu2 %v769_v57 }
  0x4a   :  { %597 = vmatpush.bf16.msrb.mxu3 %v833_v61 }
  0x4b   :  { %559 = vmatpush.bf16.msrb.mxu0 %v633_v3 }
  0x4c   :  { %572 = vmatpush.bf16.msrb.mxu1 %v697_v4 }
  0x4d   :  { %585 = vmatpush.bf16.msrb.mxu2 %v761_v5 }
  0x4e   :  { %598 = vmatpush.bf16.msrb.mxu3 %v825_v6 }
  0x80   :  { %v61_v13 = vpop.permute.xlu0 %60 }
  0x81   :  { %vm62_vm1 = vcmp.eq.s32.totalorder %v61_v13, 1 }
  0x82   :  { %vm81_vm2 = vmpackc.low %vm62_vm1, %vm62_vm1 }
  0x83   :  { %v82_v22 = vsel %vm81_vm2, 65537, %v1035_v0 }
  0x84   :  { %v83_v25 = vunpack.c.l.b16 %v82_v22 }
  0x86   :  { %v624_v31 = vunpack.i.l.s16 %v83_v25 }
  0x88   :  { %vm89_vm3 = vcmp.ne.s32.totalorder %v624_v31, %v87_v23  ;;  %vm90_vm4 = vcmp.ne.s32.totalorder %v624_v31, %v88_v24 }
  0x89   :  { %vm91_vm5 = vmpackc.low %vm90_vm4, %vm89_vm3 }
  0x8a   :  { %v106_v35 = vsel %vm91_vm5, %v71_v27, %v98_v26  ;;  %v107_v36 = vsel %vm91_vm5, %v74_v28, %v99_v29  ;;  %v108_v37 = vsel %vm91_vm5, %v77_v32, %v100_v30  ;;  %v109_v38 = vsel %vm91_vm5, %v80_v33, %v101_v34 }
  0x8b   :  { %508 = vmatmul.bf16.vlgmr.msra.gmra.mxu0 %v106_v35  ;;  %521 = vmatmul.bf16.vlgmr.msra.gmra.mxu1 %v107_v36 }
  0x8c   :  { %534 = vmatmul.bf16.vlgmr.msra.gmra.mxu2 %v108_v37  ;;  %547 = vmatmul.bf16.vlgmr.msra.gmra.mxu3 %v109_v38 }
  0x9b   :  { %560 = vmatmul.bf16.vlgmr.msrb.gmra.mxu0 %v106_v35  ;;  %573 = vmatmul.bf16.vlgmr.msrb.gmra.mxu1 %v107_v36 }
  0x9c   :  { %586 = vmatmul.bf16.vlgmr.msrb.gmra.mxu2 %v108_v37  ;;  %599 = vmatmul.bf16.vlgmr.msrb.gmra.mxu3 %v109_v38 }
 0x108   :  { %v509_v0 = vpop.f32.mrf.mxu0  ;;  %v522_v39 = vpop.f32.mrf.mxu1 }
 0x109   :  { %v510_v49 = vadd.f32 %v509_v0, %v176_v45 }
 0x10b   :  { %v523_v53 = vadd.f32 %v522_v39, %v510_v49 }
 0x10f   :  { %v535_v40 = vpop.f32.mrf.mxu2  ;;  %v548_v41 = vpop.f32.mrf.mxu3 }
 0x110   :  { %v511_v42 = vpop.f32.mrf.mxu0  ;;  %v524_v43 = vpop.f32.mrf.mxu1  ;;  %v536_v54 = vadd.f32 %v535_v40, %v523_v53 }
 0x112   :  { %v549_v61 = vadd.f32 %v548_v41, %v536_v54 }
 0x117   :  { %v537_v47 = vpop.f32.mrf.mxu2  ;;  %v550_v48 = vpop.f32.mrf.mxu3 }
 0x118   :  { %v561_v50 = vpop.f32.mrf.mxu0  ;;  %v574_v51 = vpop.f32.mrf.mxu1 }
 0x119   :  { %v562_v52 = vadd.f32 %v561_v50, %v177_v46 }
 0x11b   :  { %v575_v55 = vadd.f32 %v574_v51, %v562_v52 }
 0x11f   :  { %v587_v56 = vpop.f32.mrf.mxu2  ;;  %v600_v57 = vpop.f32.mrf.mxu3 }
 0x120   :  { %v588_v58 = vadd.f32 %v587_v56, %v575_v55  ;;  %v563_v59 = vpop.f32.mrf.mxu0  ;;  %v576_v60 = vpop.f32.mrf.mxu1 }
 0x122   :  { %v601_v62 = vadd.f32 %v600_v57, %v588_v58 }
 0x124   :  { %v604_v63 = vpack.c.bf16 %v601_v62, %v549_v61 }
 0x126   :  { %605 = vst [vmem:[#allocation7] sm:$0xff] %v604_v63 }
 0x127   :  { %v589_v1 = vpop.f32.mrf.mxu2  ;;  %v602_v2 = vpop.f32.mrf.mxu3  ;;  %616 = dma.vmem_to_hbm [thread:$0]  %s612_s8, 128, %s614_s10, [#allocation4]  }
 0x128   :  { %1029 = dma.done.wait [#allocation4], 128  }
 0x129   :  { %1030 = vsyncadd [#allocation4], 4294967168 }
 0x12a   :  { %621 = vsyncpa [#allocation3], 1 }
 0x12b   :  { %622 = vsyncpa [#allocation6], 1 }
 0x12c   :  { %623 = vsyncpa [#allocation4], 1 }

</bundles_post_ra>
